<compile_context>
chip_gen: v7x
topology: tpu7x:2x2x1
jax: 0.10.0
libtpu: 0.0.40
codegen_flags: <defaults>
</compile_context>

<pallas_src>
import math

import jax
import jax.numpy as jnp
from jax.experimental import pallas as pl
from jax.experimental.pallas import tpu as pltpu

_TARGET_BLOCK_BYTES = 4 << 20   # ~4 MiB blocks: past the HBM-roofline knee and
                                # amortizes the ~0.35 us fixed per-step cost.
_VMEM_LIMIT_BYTES = 32 << 20    # Fits the 16 MiB double-buffered footprint at
                                # 4 MiB blocks; raises v5e's 16 MiB default.


def _detect_native_16bit_valu():
    """v6e / v7x VPUs have native bf16/fp16 VALU; v5e (and older) do not."""
    try:
        kind = jax.devices()[0].device_kind.lower()
    except Exception:
        return True
    return not any(tag in kind for tag in ("v2", "v3", "v4", "v5"))


_NATIVE_16BIT_VALU = _detect_native_16bit_valu()


def _compute_dtype_for(x_dtype):
    x_dtype = jnp.dtype(x_dtype)
    if x_dtype == jnp.dtype(jnp.float32):
        return jnp.float32
    if x_dtype in (jnp.dtype(jnp.bfloat16), jnp.dtype(jnp.float16)):
        # Skip the f32 upcast on v6e/v7x: halves VALU work and vreg pressure.
        return x_dtype if _NATIVE_16BIT_VALU else jnp.float32
    return jnp.float32


def _make_scale_kernel(compute_dtype):
    def _scale_kernel(var_ref, x_ref, o_ref):
        # var_ref: (1,1) f32 in SMEM; x_ref/o_ref: (tile_m, lanes) VMEM tiles.
        s = jnp.maximum(var_ref[0, 0], jnp.float32(0.0)).astype(compute_dtype)
        o_ref[...] = (x_ref[...].astype(compute_dtype) * s).astype(o_ref.dtype)
    return _scale_kernel


def _choose_slab(n, itemsize):
    """Lane-dense (rows, lanes) slab + row-tile for n elements (n % 128 == 0)."""
    sub = {1: 32, 2: 16}.get(itemsize, 8)  # sublane packing per vreg

    lanes = 128
    for cand in range(4096, 127, -128):    # any multiple of 128, widest first
        if n % cand == 0:
            lanes = cand
            break

    rows = n // lanes
    if rows <= sub:
        tile_m = rows  # full-extent sublane dim is a legal block shape
    else:
        target_rows = max(sub, _TARGET_BLOCK_BYTES // (lanes * itemsize))
        tile_m = max((min(target_rows, rows) // sub) * sub, sub)
        if pl.cdiv(rows, tile_m) < 2:
            # Guarantee >=2 grid steps so v7x's two TensorCores both stream.
            half = ((pl.cdiv(rows, 2) + sub - 1) // sub) * sub
            if 0 < half < rows:
                tile_m = max(half, sub)
    return rows, lanes, tile_m


def _scale_slab(x2d, var2d, compute_dtype, tile_m, lanes):
    rows = x2d.shape[0]
    itemsize = jnp.dtype(x2d.dtype).itemsize
    n = rows * lanes
    return pl.pallas_call(
        _make_scale_kernel(compute_dtype),
        out_shape=jax.ShapeDtypeStruct((rows, lanes), x2d.dtype),
        grid=(pl.cdiv(rows, tile_m),),
        in_specs=[
            pl.BlockSpec(memory_space=pltpu.SMEM),            # scalar variance
            pl.BlockSpec((tile_m, lanes), lambda i: (i, 0)),  # x tile
        ],
        out_specs=pl.BlockSpec((tile_m, lanes), lambda i: (i, 0)),
        compiler_params=pltpu.CompilerParams(
            dimension_semantics=("parallel",),
            vmem_limit_bytes=_VMEM_LIMIT_BYTES,
        ),
        cost_estimate=pl.CostEstimate(
            flops=n, transcendentals=0, bytes_accessed=2 * n * itemsize),
    )(var2d, x2d)


def scale_network_forward(x, variance):
    """Computes relu(variance) * x. x: any shape, variance: scalar parameter."""
    orig_shape = x.shape
    n = math.prod(orig_shape) if orig_shape else 1
    itemsize = jnp.dtype(x.dtype).itemsize
    compute_dtype = _compute_dtype_for(x.dtype)

    var2d = jnp.asarray(variance, dtype=jnp.float32).reshape(1, 1)

    def _jnp_scale(v):  # only for tiny (<128-element) pieces
        s = jnp.maximum(var2d[0, 0], jnp.float32(0.0)).astype(compute_dtype)
        return (v.astype(compute_dtype) * s).astype(x.dtype)

    flat = x.reshape(-1)
    n_main = (n // 128) * 128
    tail_len = n - n_main

    if n_main == 0:
        # Tiny tensor: a kernel launch is pure overhead.
        return _jnp_scale(flat).reshape(orig_shape)

    if tail_len == 0:
        # Common case (conv-style NCHW): pure metadata reshapes, single HBM pass
        # in + single pass out, unmasked lane-dense stores.
        rows, lanes, tile_m = _choose_slab(n, itemsize)
        out2d = _scale_slab(flat.reshape(rows, lanes), var2d,
                            compute_dtype, tile_m, lanes)
        return out2d.reshape(orig_shape)

    # Rare fallback (element count not a multiple of 128): run the kernel on
    # the 128-aligned prefix and handle the <128-element tail with a trivial
    # jnp op instead of full-tensor pad + post-slice.
    rows, lanes, tile_m = _choose_slab(n_main, itemsize)
    out_main = _scale_slab(flat[:n_main].reshape(rows, lanes), var2d,
                           compute_dtype, tile_m, lanes)
    out_tail = _jnp_scale(flat[n_main:])
    out = jnp.concatenate([out_main.reshape(-1), out_tail])
    return out.reshape(orig_shape)


if __name__ == "__main__":
    key = jax.random.PRNGKey(0)
    init_val = 0.5
    variance = jnp.array(init_val, dtype=jnp.float32)
    relu_var = jnp.maximum(variance, 0.0)

    # Small NCHW input consistent with the conv-style usage.
    x = jax.random.normal(key, (2, 4, 16, 16), dtype=jnp.float32)
    out = jax.block_until_ready(scale_network_forward(x, variance))
    assert out.shape == x.shape
    assert jnp.allclose(out, relu_var * x, atol=1e-6), "mismatch vs reference"

    # Larger shape: exercises the multi-step (>=2 blocks) grid path.
    x_big = jax.random.normal(jax.random.PRNGKey(2), (4, 32, 32, 32), jnp.float32)
    out_big = jax.block_until_ready(scale_network_forward(x_big, variance))
    assert jnp.allclose(out_big, relu_var * x_big, atol=1e-6)

    # bf16: exercises the native-16-bit (v6e/v7x) / f32-upcast (v5e) paths.
    x_bf16 = jax.random.normal(jax.random.PRNGKey(3), (2, 4, 16, 16), jnp.bfloat16)
    out_bf16 = jax.block_until_ready(scale_network_forward(x_bf16, variance))
    ref_bf16 = (x_bf16.astype(jnp.float32) * relu_var).astype(jnp.bfloat16)
    assert jnp.allclose(out_bf16.astype(jnp.float32),
                        ref_bf16.astype(jnp.float32), rtol=2e-2, atol=2e-2)

    # Odd element count (not a multiple of 128): prefix-kernel + tiny tail path.
    x_odd = jax.random.normal(jax.random.PRNGKey(1), (2, 3, 5, 7), jnp.float32)
    out_odd = jax.block_until_ready(scale_network_forward(x_odd, variance))
    assert jnp.allclose(out_odd, relu_var * x_odd, atol=1e-6)

    print("KERNEL_OK")
</pallas_src>

<mosaic_0001>
module attributes {stable_mosaic.version = 11 : i64} {
  func.func @_scale_kernel(%arg0: i32, %arg1: memref<1x1xf32, #tpu.memory_space<smem>>, %arg2: memref<1x2048xf32, #tpu.memory_space<vmem>>, %arg3: memref<1x2048xf32, #tpu.memory_space<vmem>>) attributes {dimension_semantics = [#tpu.dimension_semantics<parallel>], iteration_bounds = array<i64: 1>, scalar_prefetch = 0 : i64, scratch_operands = 0 : i64, tpu.core_type = #tpu.core_type<tc>, window_params = [{transform_indices = @transform_0, window_bounds = array<i64: 1, 1>}, {transform_indices = @transform_1, window_bounds = array<i64: 1, 2048>}, {transform_indices = @transform_2, window_bounds = array<i64: 1, 2048>}]} {
    %c0 = arith.constant 0 : index
    %c0_0 = arith.constant 0 : index
    %0 = memref.load %arg1[%c0, %c0_0] : memref<1x1xf32, #tpu.memory_space<smem>>
    %cst = arith.constant 0.000000e+00 : f32
    %1 = arith.maximumf %0, %cst : f32
    %c0_1 = arith.constant 0 : index
    %c0_2 = arith.constant 0 : index
    %2 = vector.load %arg2[%c0_1, %c0_2] : memref<1x2048xf32, #tpu.memory_space<vmem>>, vector<1x2048xf32>
    %3 = vector.broadcast %1 : f32 to vector<1x2048xf32>
    %4 = arith.mulf %2, %3 : vector<1x2048xf32>
    %c0_3 = arith.constant 0 : index
    %c0_4 = arith.constant 0 : index
    %5 = vector.load %arg3[%c0_3, %c0_4] : memref<1x2048xf32, #tpu.memory_space<vmem>>, vector<1x2048xf32>
    tpu.vector_store %arg3[%c0_3, %c0_4], %4 {strides = array<i32>} : memref<1x2048xf32, #tpu.memory_space<vmem>>, vector<1x2048xf32>,
    return
  }
  func.func @transform_0(%arg0: i32) -> (i32, i32) {
    %c0_i32 = arith.constant 0 : i32
    %c0_i32_0 = arith.constant 0 : i32
    %c0_i32_1 = arith.constant 0 : i32
    return %c0_i32, %c0_i32_0 : i32, i32
  }
  func.func @transform_1(%arg0: i32) -> (i32, i32) {
    %c0_i32 = arith.constant 0 : i32
    %c0_i32_0 = arith.constant 0 : i32
    return %arg0, %c0_i32 : i32, i32
  }
  func.func @transform_2(%arg0: i32) -> (i32, i32) {
    %c0_i32 = arith.constant 0 : i32
    %c0_i32_0 = arith.constant 0 : i32
    return %arg0, %c0_i32 : i32, i32
  }
}

</mosaic_0001>

<bundles_post_ra>
// kernel: tpu_custom_call.1
= control target key start
LH: loop header
LB: loop body
LE: loop exit
PB: predicated region body
PF: predicated region fallthrough
CT: control target
= control target key end

     0   :  { %8 = vsyncpa [#allocation4], 0  ;;  %s145_s0 = inlined_call_operand.<no memory space> [shape: f32[1,1], index: 0, kind: input, shape index: {}]   ;;  %s146_s1 = inlined_call_operand.hbm [shape: f32[1,2048], index: 1, kind: input, shape index: {}]   ;;  %s147_s2 = inlined_call_operand.hbm [shape: f32[1,2048], index: 2, kind: output, shape index: {}]  }
   0x1   :  { %9 = vsyncpa [#allocation5], 0  ;;  %s100_s9 = smov [#allocation3]   ;;  %s52_s13 = scalar_lea.hbm %s146_s1, 256 }
   0x2   :  { %s18_s10 = sshll.u32 %s100_s9, 4  ;;  %p53_p0 = scmp.ne.s32.totalorder %s146_s1, %s52_s13  ;;  %s19_s10 = int_to_ptr.vmem [resolvable:$true] %s18_s10 }
   0x3   :  { %p56_p1 = scmp.lt.u32.totalorder %s52_s13, %s146_s1 }
   0x5   :  { %p58_p2 = pnand %p56_p1, %p53_p0 }
   0x7   :  { %61 = shalt.err (!%p58_p2)
}
   0x8   :  { %s62_s18 = scalar_lea.vmem %s19_s10, 256  ;;  %p67_p4 = scmp.lt.s32.totalorder %s19_s10, %s19_s10 }
   0x9   :  { %p63_p3 = scmp.ne.s32.totalorder %s19_s10, %s62_s18  ;;  %p68_p5 = scmp.lt.s32.totalorder %s62_s18, %s62_s18 }
   0xb   :  { %p69_p6 = por %p68_p5, %p67_p4 }
   0xd   :  { %p70_p7 = pnand %p69_p6, %p63_p3 }
   0xf   :  { %73 = shalt.err (!%p70_p7)
}
  0x10   :  { %21 = dma.hbm_to_vmem [thread:$0]  %s146_s1, 256, %s19_s10, [#allocation4]  }
  0x11   :  { %96 = dma.done.wait [#allocation4], 256  }
  0x12   :  { %97 = vsyncadd [#allocation4], 4294967040  ;;  %s101_s21 = smov 0.0   ;;  %s102_s25 = smov [#allocation6]   ;;  %v27_v1 = vld [vmem:[#allocation3] sm:$0xff]  ;;  %v28_v2 = vld [vmem:[#allocation3 + $0x8] sm:$0xff] }
  0x13   :  { %s26_s24 = smax.f32 %s101_s21, %s145_s0  ;;  %s40_s26 = sshll.u32 %s102_s25, 4  ;;  %s41_s26 = int_to_ptr.vmem [resolvable:$true] %s40_s26 }
  0x14   :  { %v29_v0 = vstv %s26_s24  ;;  %s74_s27 = scalar_lea.vmem %s41_s26, 256  ;;  %p79_p9 = scmp.lt.s32.totalorder %s41_s26, %s41_s26 }
  0x15   :  { %v30_v3 = vmul.f32 %v29_v0, %v27_v1  ;;  %v31_v4 = vmul.f32 %v29_v0, %v28_v2  ;;  %p75_p8 = scmp.ne.s32.totalorder %s41_s26, %s74_s27  ;;  %p80_p10 = scmp.lt.s32.totalorder %s74_s27, %s74_s27 }
  0x17   :  { %32 = vst [vmem:[#allocation6] sm:$0xff] %v30_v3  ;;  %33 = vst [vmem:[#allocation6 + $0x8] sm:$0xff] %v31_v4  ;;  %p81_p11 = por %p80_p10, %p79_p9 }
  0x19   :  { %p82_p12 = pnand %p81_p11, %p75_p8 }
  0x1b   :  { %85 = shalt.err (!%p82_p12)
}
  0x1c   :  { %s86_s0 = scalar_lea.hbm %s147_s2, 256 }
  0x1d   :  { %p87_p13 = scmp.ne.s32.totalorder %s147_s2, %s86_s0  ;;  %p90_p0 = scmp.lt.u32.totalorder %s86_s0, %s147_s2 }
  0x1f   :  { %p92_p1 = pnand %p90_p0, %p87_p13 }
  0x21   :  { %95 = shalt.err (!%p92_p1)
}
  0x22   :  { %43 = dma.vmem_to_hbm [thread:$0]  %s41_s26, 256, %s147_s2, [#allocation5]  }
  0x23   :  { %98 = dma.done.wait [#allocation5], 256  }
  0x24   :  { %99 = vsyncadd [#allocation5], 4294967040 }
  0x25   :  { %47 = vsyncpa [#allocation4], 1 }
  0x26   :  { %48 = vsyncpa [#allocation5], 1 }

</bundles_post_ra>
